<compile_context>
chip_gen: v7x
topology: tpu7x:2x2x1
jax: 0.10.0
libtpu: 0.0.40
codegen_flags: <defaults>
</compile_context>

<pallas_src>
import jax
import jax.numpy as jnp
from jax.experimental import pallas as pl
from jax.experimental.pallas import tpu as pltpu


def _attn_pool_kernel(x_ref, ctx_ref, mask_ref,
                      wq_ref, wk_ref, wv_ref, wo_ref,
                      hsum_ref, hexp_ref, o_ref):
    # x_ref:    (TB, C)
    # ctx_ref:  (TB, L, Dctx)
    # mask_ref: (TB, L)  int8, nonzero = keep
    # wq/wk/wv: (Dctx, C)   transposed Linear weights
    # wo:       (C, C)
    # hsum:     (C, H) 0/1  (sum channels of head h)
    # hexp:     (H, C) 0/1  (broadcast head prob back to its channels)
    # o_ref:    (TB, C)
    f32 = jnp.float32
    TB, L, Dctx = ctx_ref.shape
    C = wq_ref.shape[1]
    H = hsum_ref.shape[1]
    head_dim = C // H
    scale = head_dim ** -0.5

    ctx = ctx_ref[...]                                    # (TB, L, Dctx)
    ctx2 = ctx.reshape(TB * L, Dctx)

    # NOTE: mean pooling deliberately ignores the mask (matches the PyTorch module).
    q_in = jnp.sum(ctx, axis=1) * (1.0 / L)               # (TB, Dctx)

    # Projections: real MXU-shaped matmuls over the whole batch tile.
    q = jnp.dot(q_in, wq_ref[...], preferred_element_type=f32)   # (TB, C)
    k = jnp.dot(ctx2, wk_ref[...], preferred_element_type=f32)   # (TB*L, C)
    v = jnp.dot(ctx2, wv_ref[...], preferred_element_type=f32)   # (TB*L, C)
    k3 = k.reshape(TB, L, C)
    v3 = v.reshape(TB, L, C)

    # All-head scores in one shot: broadcast q over L (query length is 1),
    # multiply with k, then contract channels -> heads with the 0/1 matrix.
    prod = q[:, None, :] * k3                             # (TB, L, C)
    scores = jnp.dot(prod.reshape(TB * L, C), hsum_ref[...],
                     preferred_element_type=f32)          # (TB*L, H)
    scores = scores.reshape(TB, L, H) * scale             # (TB, L, H)

    # Mask (torch.masked_fill with -finfo.max, exactly like the reference).
    neg = -jnp.finfo(f32).max
    mask_f = mask_ref[...].astype(f32)                    # (TB, L)
    keep = jnp.broadcast_to(mask_f[:, :, None], (TB, L, H)) > 0.0
    scores = jnp.where(keep, scores, neg)

    # Numerically-stable softmax over the sequence axis (axis=1).
    m = jnp.max(scores, axis=1, keepdims=True)            # (TB, 1, H)
    e = jnp.exp(scores - m)                               # (TB, L, H)
    denom = jnp.sum(e, axis=1, keepdims=True)             # (TB, 1, H)
    p = e * pl.reciprocal(denom, approx=True)             # (TB, L, H)

    # Expand per-head probs back to channel layout and reduce over L.
    p_exp = jnp.dot(p.reshape(TB * L, H), hexp_ref[...],
                    preferred_element_type=f32)           # (TB*L, C)
    attn = jnp.sum(p_exp.reshape(TB, L, C) * v3, axis=1)  # (TB, C)

    out = jnp.dot(attn, wo_ref[...], preferred_element_type=f32)  # (TB, C)
    # Single lane-dense (TB, C) store per grid step.
    o_ref[...] = (x_ref[...] + out).astype(o_ref.dtype)


def prepare_attention_pooling_params(wq, wk, wv, wo, *, head_dim):
    """One-time setup: transpose nn.Linear weights (out,in)->(in,out) and build
    the tiny 0/1 head-membership matrices.  Do this once, not per forward."""
    C = wo.shape[0]
    assert C % head_dim == 0
    H = C // head_dim
    head_ids = jnp.arange(C, dtype=jnp.int32) // head_dim
    hsum = jax.nn.one_hot(head_ids, H, dtype=jnp.float32)   # (C, H)
    hexp = jnp.transpose(hsum)                               # (H, C)
    return dict(wq_t=jnp.transpose(wq), wk_t=jnp.transpose(wk),
                wv_t=jnp.transpose(wv), wo_t=jnp.transpose(wo),
                hsum=hsum, hexp=hexp)


def attention_pooling(x, context, context_mask, params, *, head_dim,
                      batch_tile=256):
    """x: (B, C) f32; context: (B, L, Dctx) f32; context_mask: (B, L) bool/int
    (or None); params: from prepare_attention_pooling_params."""
    B, L, Dctx = context.shape
    C = x.shape[-1]
    assert C % head_dim == 0
    H = C // head_dim

    if context_mask is None:
        context_mask = jnp.ones((B, L), dtype=jnp.int8)
    mask = context_mask.astype(jnp.int8)                  # 1 byte/elem DMA

    # Batch tile: 256 suits v6e/v7x MXU; use 128 on v5e if desired.
    TB = min(batch_tile, B)
    pad = (-B) % TB
    if pad:
        x = jnp.pad(x, ((0, pad), (0, 0)))
        context = jnp.pad(context, ((0, pad), (0, 0), (0, 0)))
        mask = jnp.pad(mask, ((0, pad), (0, 0)))          # padded rows fully masked
    Bp = B + pad

    out = pl.pallas_call(
        _attn_pool_kernel,
        out_shape=jax.ShapeDtypeStruct((Bp, C), x.dtype),
        grid_spec=pltpu.PrefetchScalarGridSpec(
            num_scalar_prefetch=0,
            grid=(Bp // TB,),
            in_specs=[
                pl.BlockSpec((TB, C),       lambda b: (b, 0)),     # x
                pl.BlockSpec((TB, L, Dctx), lambda b: (b, 0, 0)),  # context
                pl.BlockSpec((TB, L),       lambda b: (b, 0)),     # mask (int8)
                pl.BlockSpec((Dctx, C),     lambda b: (0, 0)),     # Wq^T
                pl.BlockSpec((Dctx, C),     lambda b: (0, 0)),     # Wk^T
                pl.BlockSpec((Dctx, C),     lambda b: (0, 0)),     # Wv^T
                pl.BlockSpec((C, C),        lambda b: (0, 0)),     # Wout^T
                pl.BlockSpec((C, H),        lambda b: (0, 0)),     # head-sum
                pl.BlockSpec((H, C),        lambda b: (0, 0)),     # head-expand
            ],
            out_specs=pl.BlockSpec((TB, C), lambda b: (b, 0)),
        ),
        compiler_params=pltpu.CompilerParams(
            dimension_semantics=("parallel",)),
    )(x, context, mask, params["wq_t"], params["wk_t"], params["wv_t"],
      params["wo_t"], params["hsum"], params["hexp"])
    return out[:B] if pad else out


def attention_pooling_ref(x, context, context_mask, wq, wk, wv, wo, *, head_dim):
    """Pure-JAX reference mirroring the PyTorch module."""
    B, L, Dctx = context.shape
    C = x.shape[-1]
    H = C // head_dim
    scale = head_dim ** -0.5

    q_in = jnp.mean(context, axis=1, keepdims=True)              # (B, 1, Dctx)
    q = q_in @ wq.T                                              # (B, 1, C)
    k = context @ wk.T                                           # (B, L, C)
    v = context @ wv.T                                           # (B, L, C)

    q = q.reshape(B, 1, H, head_dim).transpose(0, 2, 1, 3)       # (B, H, 1, D)
    k = k.reshape(B, L, H, head_dim).transpose(0, 2, 1, 3)       # (B, H, L, D)
    v = v.reshape(B, L, H, head_dim).transpose(0, 2, 1, 3)

    scores = jnp.einsum('bhid,bhjd->bhij', q, k) * scale         # (B, H, 1, L)
    neg = -jnp.finfo(jnp.float32).max
    m = context_mask.astype(bool)[:, None, None, :]
    scores = jnp.where(m, scores, neg)
    p = jax.nn.softmax(scores, axis=-1)
    out = jnp.einsum('bhij,bhjd->bhid', p, v)                    # (B, H, 1, D)
    out = out.transpose(0, 2, 1, 3).reshape(B, 1, C)
    out = out @ wo.T                                             # (B, 1, C)
    return x + out[:, 0, :]


if __name__ == "__main__":
    # Small shapes consistent with the module:
    #   num_channels (C) = 64, context_dim (Dctx) = 32, head_dim = 32 -> 2 heads
    B, L, Dctx, C, HEAD_DIM = 2, 8, 32, 64, 32

    key = jax.random.PRNGKey(0)
    kx, kc, kq, kk, kv, ko = jax.random.split(key, 6)

    x = jax.random.normal(kx, (B, C), dtype=jnp.float32)
    context = jax.random.normal(kc, (B, L, Dctx), dtype=jnp.float32)
    # mask out the last two context tokens of batch element 1
    context_mask = jnp.ones((B, L), dtype=bool).at[1, -2:].set(False)

    # Deterministic synthetic weights (nn.Linear layout: (out_features, in_features))
    wq = 0.02 * jax.random.normal(kq, (C, Dctx), dtype=jnp.float32)
    wk = 0.02 * jax.random.normal(kk, (C, Dctx), dtype=jnp.float32)
    wv = 0.02 * jax.random.normal(kv, (C, Dctx), dtype=jnp.float32)
    wo = 0.02 * jax.random.normal(ko, (C, C), dtype=jnp.float32)

    params = prepare_attention_pooling_params(wq, wk, wv, wo, head_dim=HEAD_DIM)

    out = attention_pooling(x, context, context_mask, params, head_dim=HEAD_DIM)
    out = jax.block_until_ready(out)
    ref = attention_pooling_ref(x, context, context_mask, wq, wk, wv, wo,
                                head_dim=HEAD_DIM)
    assert out.shape == (B, C)
    # Tolerance covers MXU default-precision + approx reciprocal differences.
    assert jnp.allclose(out, ref, atol=2e-3, rtol=2e-3), \
        f"max abs diff {jnp.max(jnp.abs(out - ref))}"

    # Second check: exercise the batch-tiled multi-step grid (+ padding path).
    B2 = 80
    k2x, k2c, k2m = jax.random.split(jax.random.PRNGKey(1), 3)
    x2 = jax.random.normal(k2x, (B2, C), dtype=jnp.float32)
    ctx2 = jax.random.normal(k2c, (B2, L, Dctx), dtype=jnp.float32)
    mask2 = jax.random.uniform(k2m, (B2, L)) > 0.25
    out2 = jax.block_until_ready(
        attention_pooling(x2, ctx2, mask2, params, head_dim=HEAD_DIM,
                          batch_tile=32))
    ref2 = attention_pooling_ref(x2, ctx2, mask2, wq, wk, wv, wo,
                                 head_dim=HEAD_DIM)
    assert out2.shape == (B2, C)
    assert jnp.allclose(out2, ref2, atol=2e-3, rtol=2e-3), \
        f"max abs diff {jnp.max(jnp.abs(out2 - ref2))}"

    print("KERNEL_OK")
</pallas_src>

<mosaic_0001>
module attributes {stable_mosaic.version = 11 : i64} {
  func.func @_attn_pool_kernel(%arg0: i32, %arg1: memref<2x64xf32, #tpu.memory_space<vmem>>, %arg2: memref<2x8x32xf32, #tpu.memory_space<vmem>>, %arg3: memref<2x8xi8, #tpu.memory_space<vmem>>, %arg4: memref<32x64xf32, #tpu.memory_space<vmem>>, %arg5: memref<32x64xf32, #tpu.memory_space<vmem>>, %arg6: memref<32x64xf32, #tpu.memory_space<vmem>>, %arg7: memref<64x64xf32, #tpu.memory_space<vmem>>, %arg8: memref<64x2xf32, #tpu.memory_space<vmem>>, %arg9: memref<2x64xf32, #tpu.memory_space<vmem>>, %arg10: memref<2x64xf32, #tpu.memory_space<vmem>>) attributes {dimension_semantics = [#tpu.dimension_semantics<parallel>], iteration_bounds = array<i64: 1>, scalar_prefetch = 0 : i64, scratch_operands = 0 : i64, tpu.core_type = #tpu.core_type<tc>, window_params = [{transform_indices = @transform_0, window_bounds = array<i64: 2, 64>}, {transform_indices = @transform_1, window_bounds = array<i64: 2, 8, 32>}, {transform_indices = @transform_2, window_bounds = array<i64: 2, 8>}, {pipeline_mode = #tpu.pipeline_mode<synchronous>, transform_indices = @transform_3, window_bounds = array<i64: 32, 64>}, {pipeline_mode = #tpu.pipeline_mode<synchronous>, transform_indices = @transform_4, window_bounds = array<i64: 32, 64>}, {pipeline_mode = #tpu.pipeline_mode<synchronous>, transform_indices = @transform_5, window_bounds = array<i64: 32, 64>}, {pipeline_mode = #tpu.pipeline_mode<synchronous>, transform_indices = @transform_6, window_bounds = array<i64: 64, 64>}, {pipeline_mode = #tpu.pipeline_mode<synchronous>, transform_indices = @transform_7, window_bounds = array<i64: 64, 2>}, {pipeline_mode = #tpu.pipeline_mode<synchronous>, transform_indices = @transform_8, window_bounds = array<i64: 2, 64>}, {transform_indices = @transform_9, window_bounds = array<i64: 2, 64>}]} {
    %c0 = arith.constant 0 : index
    %c0_0 = arith.constant 0 : index
    %c0_1 = arith.constant 0 : index
    %0 = vector.load %arg2[%c0, %c0_0, %c0_1] : memref<2x8x32xf32, #tpu.memory_space<vmem>>, vector<2x8x32xf32>
    %1 = vector.shape_cast %0 : vector<2x8x32xf32> to vector<16x32xf32>
    %cst = arith.constant dense<0.000000e+00> : vector<2x32xf32>
    %2 = vector.multi_reduction <add>, %0, %cst [1] : vector<2x8x32xf32> to vector<2x32xf32>
    %cst_2 = arith.constant 1.250000e-01 : f32
    %3 = vector.broadcast %cst_2 : f32 to vector<2x32xf32>
    %4 = arith.mulf %2, %3 : vector<2x32xf32>
    %c0_3 = arith.constant 0 : index
    %c0_4 = arith.constant 0 : index
    %5 = vector.load %arg4[%c0_3, %c0_4] : memref<32x64xf32, #tpu.memory_space<vmem>>, vector<32x64xf32>
    %cst_5 = arith.constant dense<0.000000e+00> : vector<2x64xf32>
    %6 = tpu.matmul %4, %5, %cst_5 {dimension_numbers = #tpu.dot_dimension_numbers<[1], [0], [0], [1], [0, 0, 1, 1], [], []>} : vector<2x32xf32>, vector<32x64xf32>, vector<2x64xf32> -> vector<2x64xf32>
    %c0_6 = arith.constant 0 : index
    %c0_7 = arith.constant 0 : index
    %7 = vector.load %arg5[%c0_6, %c0_7] : memref<32x64xf32, #tpu.memory_space<vmem>>, vector<32x64xf32>
    %cst_8 = arith.constant dense<0.000000e+00> : vector<16x64xf32>
    %8 = tpu.matmul %1, %7, %cst_8 {dimension_numbers = #tpu.dot_dimension_numbers<[1], [0], [0], [1], [0, 0, 1, 1], [], []>} : vector<16x32xf32>, vector<32x64xf32>, vector<16x64xf32> -> vector<16x64xf32>
    %c0_9 = arith.constant 0 : index
    %c0_10 = arith.constant 0 : index
    %9 = vector.load %arg6[%c0_9, %c0_10] : memref<32x64xf32, #tpu.memory_space<vmem>>, vector<32x64xf32>
    %cst_11 = arith.constant dense<0.000000e+00> : vector<16x64xf32>
    %10 = tpu.matmul %1, %9, %cst_11 {dimension_numbers = #tpu.dot_dimension_numbers<[1], [0], [0], [1], [0, 0, 1, 1], [], []>} : vector<16x32xf32>, vector<32x64xf32>, vector<16x64xf32> -> vector<16x64xf32>
    %11 = vector.shape_cast %8 : vector<16x64xf32> to vector<2x8x64xf32>
    %12 = vector.shape_cast %10 : vector<16x64xf32> to vector<2x8x64xf32>
    %13 = vector.shape_cast %6 : vector<2x64xf32> to vector<2x1x64xf32>
    %14 = vector.broadcast %13 : vector<2x1x64xf32> to vector<2x8x64xf32>
    %15 = arith.mulf %14, %11 : vector<2x8x64xf32>
    %16 = vector.shape_cast %15 : vector<2x8x64xf32> to vector<16x64xf32>
    %c0_12 = arith.constant 0 : index
    %c0_13 = arith.constant 0 : index
    %17 = vector.load %arg8[%c0_12, %c0_13] : memref<64x2xf32, #tpu.memory_space<vmem>>, vector<64x2xf32>
    %cst_14 = arith.constant dense<0.000000e+00> : vector<16x2xf32>
    %18 = tpu.matmul %16, %17, %cst_14 {dimension_numbers = #tpu.dot_dimension_numbers<[1], [0], [0], [1], [0, 0, 1, 1], [], []>} : vector<16x64xf32>, vector<64x2xf32>, vector<16x2xf32> -> vector<16x2xf32>
    %19 = vector.shape_cast %18 : vector<16x2xf32> to vector<2x8x2xf32>
    %cst_15 = arith.constant 0.176776692 : f32
    %20 = vector.broadcast %cst_15 : f32 to vector<2x8x2xf32>
    %21 = arith.mulf %19, %20 : vector<2x8x2xf32>
    %c0_16 = arith.constant 0 : index
    %c0_17 = arith.constant 0 : index
    %22 = vector.load %arg3[%c0_16, %c0_17] : memref<2x8xi8, #tpu.memory_space<vmem>>, vector<2x8xi8>
    %23 = arith.sitofp %22 : vector<2x8xi8> to vector<2x8xf32>
    %24 = vector.shape_cast %23 : vector<2x8xf32> to vector<2x8x1xf32>
    %25 = vector.shape_cast %24 : vector<2x8x1xf32> to vector<2x8x1xf32>
    %26 = vector.broadcast %25 : vector<2x8x1xf32> to vector<2x8x2xf32>
    %cst_18 = arith.constant 0.000000e+00 : f32
    %27 = vector.broadcast %cst_18 : f32 to vector<2x8x2xf32>
    %28 = arith.cmpf ogt, %26, %27 : vector<2x8x2xf32>
    %cst_19 = arith.constant -3.40282347E+38 : f32
    %29 = vector.broadcast %cst_19 : f32 to vector<2x8x2xf32>
    %30 = arith.select %28, %21, %29 : vector<2x8x2xi1>, vector<2x8x2xf32>
    %cst_20 = arith.constant dense<0xFF800000> : vector<2x2xf32>
    %31 = vector.multi_reduction <maximumf>, %30, %cst_20 [1] : vector<2x8x2xf32> to vector<2x2xf32>
    %32 = vector.shape_cast %31 : vector<2x2xf32> to vector<2x1x2xf32>
    %33 = vector.broadcast %32 : vector<2x1x2xf32> to vector<2x8x2xf32>
    %34 = arith.subf %30, %33 : vector<2x8x2xf32>
    %35 = math.exp %34 : vector<2x8x2xf32>
    %cst_21 = arith.constant dense<0.000000e+00> : vector<2x2xf32>
    %36 = vector.multi_reduction <add>, %35, %cst_21 [1] : vector<2x8x2xf32> to vector<2x2xf32>
    %37 = vector.shape_cast %36 : vector<2x2xf32> to vector<2x1x2xf32>
    %38 = tpu.reciprocal %37 {approx = true} : vector<2x1x2xf32> -> vector<2x1x2xf32>
    %39 = vector.broadcast %38 : vector<2x1x2xf32> to vector<2x8x2xf32>
    %40 = arith.mulf %35, %39 : vector<2x8x2xf32>
    %41 = vector.shape_cast %40 : vector<2x8x2xf32> to vector<16x2xf32>
    %c0_22 = arith.constant 0 : index
    %c0_23 = arith.constant 0 : index
    %42 = vector.load %arg9[%c0_22, %c0_23] : memref<2x64xf32, #tpu.memory_space<vmem>>, vector<2x64xf32>
    %cst_24 = arith.constant dense<0.000000e+00> : vector<16x64xf32>
    %43 = tpu.matmul %41, %42, %cst_24 {dimension_numbers = #tpu.dot_dimension_numbers<[1], [0], [0], [1], [0, 0, 1, 1], [], []>} : vector<16x2xf32>, vector<2x64xf32>, vector<16x64xf32> -> vector<16x64xf32>
    %44 = vector.shape_cast %43 : vector<16x64xf32> to vector<2x8x64xf32>
    %45 = arith.mulf %44, %12 : vector<2x8x64xf32>
    %cst_25 = arith.constant dense<0.000000e+00> : vector<2x64xf32>
    %46 = vector.multi_reduction <add>, %45, %cst_25 [1] : vector<2x8x64xf32> to vector<2x64xf32>
    %c0_26 = arith.constant 0 : index
    %c0_27 = arith.constant 0 : index
    %47 = vector.load %arg7[%c0_26, %c0_27] : memref<64x64xf32, #tpu.memory_space<vmem>>, vector<64x64xf32>
    %cst_28 = arith.constant dense<0.000000e+00> : vector<2x64xf32>
    %48 = tpu.matmul %46, %47, %cst_28 {dimension_numbers = #tpu.dot_dimension_numbers<[1], [0], [0], [1], [0, 0, 1, 1], [], []>} : vector<2x64xf32>, vector<64x64xf32>, vector<2x64xf32> -> vector<2x64xf32>
    %c0_29 = arith.constant 0 : index
    %c0_30 = arith.constant 0 : index
    %49 = vector.load %arg1[%c0_29, %c0_30] : memref<2x64xf32, #tpu.memory_space<vmem>>, vector<2x64xf32>
    %50 = arith.addf %49, %48 : vector<2x64xf32>
    %c0_31 = arith.constant 0 : index
    %c0_32 = arith.constant 0 : index
    %51 = vector.load %arg10[%c0_31, %c0_32] : memref<2x64xf32, #tpu.memory_space<vmem>>, vector<2x64xf32>
    tpu.vector_store %arg10[%c0_31, %c0_32], %50 {strides = array<i32>} : memref<2x64xf32, #tpu.memory_space<vmem>>, vector<2x64xf32>,
    return
  }
  func.func @transform_0(%arg0: i32) -> (i32, i32) {
    %c0_i32 = arith.constant 0 : i32
    %c0_i32_0 = arith.constant 0 : i32
    return %arg0, %c0_i32 : i32, i32
  }
  func.func @transform_1(%arg0: i32) -> (i32, i32, i32) {
    %c0_i32 = arith.constant 0 : i32
    %c0_i32_0 = arith.constant 0 : i32
    %c0_i32_1 = arith.constant 0 : i32
    return %arg0, %c0_i32, %c0_i32_0 : i32, i32, i32
  }
  func.func @transform_2(%arg0: i32) -> (i32, i32) {
    %c0_i32 = arith.constant 0 : i32
    %c0_i32_0 = arith.constant 0 : i32
    return %arg0, %c0_i32 : i32, i32
  }
  func.func @transform_3(%arg0: i32) -> (i32, i32) {
    %c0_i32 = arith.constant 0 : i32
    %c0_i32_0 = arith.constant 0 : i32
    %c0_i32_1 = arith.constant 0 : i32
    return %c0_i32, %c0_i32_0 : i32, i32
  }
  func.func @transform_4(%arg0: i32) -> (i32, i32) {
    %c0_i32 = arith.constant 0 : i32
    %c0_i32_0 = arith.constant 0 : i32
    %c0_i32_1 = arith.constant 0 : i32
    return %c0_i32, %c0_i32_0 : i32, i32
  }
  func.func @transform_5(%arg0: i32) -> (i32, i32) {
    %c0_i32 = arith.constant 0 : i32
    %c0_i32_0 = arith.constant 0 : i32
    %c0_i32_1 = arith.constant 0 : i32
    return %c0_i32, %c0_i32_0 : i32, i32
  }
  func.func @transform_6(%arg0: i32) -> (i32, i32) {
    %c0_i32 = arith.constant 0 : i32
    %c0_i32_0 = arith.constant 0 : i32
    %c0_i32_1 = arith.constant 0 : i32
    return %c0_i32, %c0_i32_0 : i32, i32
  }
  func.func @transform_7(%arg0: i32) -> (i32, i32) {
    %c0_i32 = arith.constant 0 : i32
    %c0_i32_0 = arith.constant 0 : i32
    %c0_i32_1 = arith.constant 0 : i32
    return %c0_i32, %c0_i32_0 : i32, i32
  }
  func.func @transform_8(%arg0: i32) -> (i32, i32) {
    %c0_i32 = arith.constant 0 : i32
    %c0_i32_0 = arith.constant 0 : i32
    %c0_i32_1 = arith.constant 0 : i32
    return %c0_i32, %c0_i32_0 : i32, i32
  }
  func.func @transform_9(%arg0: i32) -> (i32, i32) {
    %c0_i32 = arith.constant 0 : i32
    %c0_i32_0 = arith.constant 0 : i32
    return %arg0, %c0_i32 : i32, i32
  }
}

</mosaic_0001>

<bundles_post_ra>
// kernel: tpu_custom_call.1
= control target key start
LH: loop header
LB: loop body
LE: loop exit
PB: predicated region body
PF: predicated region fallthrough
CT: control target
= control target key end

     0   :  { %14 = vsyncpa [#allocation3], 0  ;;  %s1239_s0 = inlined_call_operand.vmem [shape: f32[2,64], index: 0, kind: input, shape index: {}]   ;;  %s1240_s1 = inlined_call_operand.vmem [shape: f32[2,8,32], index: 1, kind: input, shape index: {}]   ;;  %s1241_s2 = inlined_call_operand.vmem [shape: s8[2,8], index: 2, kind: input, shape index: {}]   ;;  %s1242_s3 = inlined_call_operand.hbm [shape: f32[32,64], index: 3, kind: input, shape index: {}]   ;;  %s1243_s4 = inlined_call_operand.hbm [shape: f32[32,64], index: 4, kind: input, shape index: {}]   ;;  %s1244_s5 = inlined_call_operand.hbm [shape: f32[32,64], index: 5, kind: input, shape index: {}]   ;;  %s1245_s6 = inlined_call_operand.vmem [shape: f32[64,64], index: 6, kind: input, shape index: {}]   ;;  %s1246_s7 = inlined_call_operand.vmem [shape: f32[64,2], index: 7, kind: input, shape index: {}]   ;;  %s1247_s8 = inlined_call_operand.vmem [shape: f32[2,64], index: 8, kind: input, shape index: {}]   ;;  %s1248_s9 = inlined_call_operand.hbm [shape: f32[2,64], index: 9, kind: output, shape index: {}]  }
   0x1   :  { %15 = vsyncpa [#allocation6], 0 }
   0x2   :  { %16 = vsyncpa [#allocation4], 0  ;;  %s1017_s30 = smov [#allocation5]   ;;  %s1018_s11 = smov [#allocation2]  }
   0x3   :  { %s40_s10 = sshll.u32 %s1017_s30, 4  ;;  %s28_s12 = sshll.u32 %s1018_s11, 4  ;;  %s41_s10 = int_to_ptr.vmem [resolvable:$true] %s40_s10  ;;  %s1077_s12 = int_to_ptr.vmem [resolvable:$true] %s28_s12 }
   0x4   :  { %s923_s15 = scalar_lea.hbm %s1243_s4, 512 }
   0x5   :  { %p924_p0 = scmp.ne.s32.totalorder %s1243_s4, %s923_s15  ;;  %p927_p1 = scmp.lt.u32.totalorder %s923_s15, %s1243_s4 }
   0x7   :  { %p929_p2 = pnand %p927_p1, %p924_p0 }
   0x9   :  { %932 = shalt.err (!%p929_p2)
}
   0xa   :  { %s933_s20 = scalar_lea.vmem %s41_s10, 512  ;;  %p938_p4 = scmp.lt.s32.totalorder %s41_s10, %s41_s10 }
   0xb   :  { %p934_p3 = scmp.ne.s32.totalorder %s41_s10, %s933_s20  ;;  %p939_p5 = scmp.lt.s32.totalorder %s933_s20, %s933_s20 }
   0xd   :  { %p940_p6 = por %p939_p5, %p938_p4 }
   0xf   :  { %p941_p7 = pnand %p940_p6, %p934_p3 }
  0x11   :  { %944 = shalt.err (!%p941_p7)
}
  0x12   :  { %s1019_s21 = smov 128   ;;  %s1020_s22 = smov 8  }
  0x13   :  { %46 = dma.hbm_to_vmem [thread:$0]  %s1243_s4, 512, %s41_s10, [#allocation6], %s1019_s21, %s1019_s21, %s1020_s22  }
  0x14   :  { %s945_s27 = scalar_lea.hbm %s1242_s3, 512 }
  0x15   :  { %p946_p8 = scmp.ne.s32.totalorder %s1242_s3, %s945_s27  ;;  %p949_p9 = scmp.lt.u32.totalorder %s945_s27, %s1242_s3 }
  0x17   :  { %p951_p10 = pnand %p949_p9, %p946_p8 }
  0x19   :  { %954 = shalt.err (!%p951_p10)
}
  0x1a   :  { %s955_s13 = scalar_lea.vmem %s1077_s12, 512  ;;  %p960_p12 = scmp.lt.s32.totalorder %s1077_s12, %s1077_s12 }
  0x1b   :  { %p956_p11 = scmp.ne.s32.totalorder %s1077_s12, %s955_s13  ;;  %p961_p13 = scmp.lt.s32.totalorder %s955_s13, %s955_s13 }
  0x1d   :  { %p962_p0 = por %p961_p13, %p960_p12 }
  0x1f   :  { %p963_p1 = pnand %p962_p0, %p956_p11 }
  0x21   :  { %966 = shalt.err (!%p963_p1)
}
  0x22   :  { %34 = dma.hbm_to_vmem [thread:$0]  %s1242_s3, 512, %s1077_s12, [#allocation3], %s1019_s21, %s1019_s21, %s1020_s22  }
  0x23   :  { %s1021_s14 = smov [#allocation7]   ;;  %s967_s18 = scalar_lea.hbm %s1244_s5, 512 }
  0x24   :  { %s52_s15 = sshll.u32 %s1021_s14, 4  ;;  %p968_p2 = scmp.ne.s32.totalorder %s1244_s5, %s967_s18  ;;  %s53_s15 = int_to_ptr.vmem [resolvable:$true] %s52_s15 }
  0x25   :  { %p971_p3 = scmp.lt.u32.totalorder %s967_s18, %s1244_s5 }
  0x27   :  { %p973_p4 = pnand %p971_p3, %p968_p2 }
  0x29   :  { %976 = shalt.err (!%p973_p4)
}
  0x2a   :  { %s977_s25 = scalar_lea.vmem %s53_s15, 512  ;;  %p982_p6 = scmp.lt.s32.totalorder %s53_s15, %s53_s15 }
  0x2b   :  { %p978_p5 = scmp.ne.s32.totalorder %s53_s15, %s977_s25  ;;  %p983_p7 = scmp.lt.s32.totalorder %s977_s25, %s977_s25 }
  0x2d   :  { %p984_p8 = por %p983_p7, %p982_p6 }
  0x2f   :  { %p985_p9 = pnand %p984_p8, %p978_p5 }
  0x31   :  { %988 = shalt.err (!%p985_p9)
}
  0x32   :  { %58 = dma.hbm_to_vmem [thread:$0]  %s1244_s5, 512, %s53_s15, [#allocation6], %s1019_s21, %s1019_s21, %s1020_s22  }
  0x33   :  { %1011 = dma.done.wait [#allocation3], 512  }
  0x34   :  { %1012 = vsyncadd [#allocation3], 4294966784 }
  0x35   :  { %1013 = dma.done.wait [#allocation6], 1024  }
  0x36   :  { %1014 = vsyncadd [#allocation6], 4294966272  ;;  %v1022_v0 = vmov 0.0|0.0   ;;  %vm1023_vm0 = vmmov 0   ;;  %v1024_v1 = vmov 0.0   ;;  %v93_v2 = vld [vmem:[#allocation2] sm:$0xff]  ;;  %v341_v45 = vlaneseq }
  0x37   :  { %855 = vmatprep.subr.bf16.mxu1 %v1022_v0  ;;  %787 = vmatprep.mubr.msk.f32.mxu1 %vm1023_vm0, %v1024_v1  ;;  %v94_v3 = vld [vmem:[#allocation2 + $0x8] sm:$0xff]  ;;  %v95_v4 = vld [vmem:[#allocation2 + $0x10] sm:$0xff]  ;;  %vm76_vm1 = vcmask 261120   ;;  %v96_v6 = vld [vmem:[#allocation2 + $0x18] sm:$0xff]  ;;  %vm99_vm2 = vcmask 1041409   ;;  %vm380_vm3 = vcmask 523264  }
  0x38   :  { %v856_v5 = vpack.c.bf16 %v94_v3, %v93_v2  ;;  %v173_v7 = vld [vmem:[#allocation5] sm:$0xff]  ;;  %v174_v8 = vld [vmem:[#allocation5 + $0x8] sm:$0xff]  ;;  %v859_v11 = vpack.c.bf16 %v96_v6, %v95_v4  ;;  %v175_v27 = vld [vmem:[#allocation5 + $0x10] sm:$0xff]  ;;  %v342_v47 = vshrl.u32 %v341_v45, 7  ;;  %v1025_v54 = vmov 1966171168  }
  0x39   :  { %v74_v9 = vld [vmem:[%s1240_s1] sm:$0xff]  ;;  %v1138_v10 = vld [vmem:[%s1240_s1 + $0x8] sm:$0xff]  ;;  %v861_v14 = vpack.c.bf16 %v174_v8, %v173_v7  ;;  %v176_v28 = vld [vmem:[#allocation5 + $0x18] sm:$0xff]  ;;  %v339_v55 = vunpack.c.l.s4 %v1025_v54  ;;  %vm531_vm4 = vcmask 1041408   ;;  %vm485_vm6 = vcmask 15360   ;;  %s1026_s14 = smov [#allocation8]  }
  0x3a   :  { %857 = vmatpush3.bf16.msra.mxu1 %v856_v5  ;;  %v77_v12 = vsel %vm76_vm1, %v74_v9, 0.0  ;;  %v84_v13 = vsel %vm76_vm1, %v1138_v10, 0.0  ;;  %809 = vmatprep.mubr.msk.f32.mxu0 %vm76_vm1, %v74_v9  ;;  %v865_v31 = vpack.c.bf16 %v176_v28, %v175_v27  ;;  %v372_v33 = vld [vmem:[%s1246_s7] sm:$0xff]  ;;  %v373_v34 = vld [vmem:[%s1246_s7 + $0x8] sm:$0xff]  ;;  %v374_v36 = vld [vmem:[%s1246_s7 + $0x10] sm:$0xff]  ;;  %v362_v49 = vsub.s32 0, %v342_v47 }
  0x3b   :  { %858 = vmatprep.subr.bf16.mxu1 %v1022_v0  ;;  %v78_v15 = vrot.slane %v77_v12, 4  ;;  %v85_v16 = vrot.slane %v84_v13, 4  ;;  %v877_v35 = vpack.c.bf16 %v373_v34, %v372_v33  ;;  %v375_v37 = vld [vmem:[%s1246_s7 + $0x18] sm:$0xff]  ;;  %v376_v39 = vld [vmem:[%s1246_s7 + $0x20] sm:$0xff]  ;;  %v377_v40 = vld [vmem:[%s1246_s7 + $0x28] sm:$0xff]  ;;  %v476_v51 = vsub.s32 1, %v342_v47 }
  0x3c   :  { %v881_v38 = vpack.c.bf16 %v375_v37, %v374_v36  ;;  %v885_v41 = vpack.c.bf16 %v377_v40, %v376_v39  ;;  %v378_v42 = vld [vmem:[%s1246_s7 + $0x30] sm:$0xff]  ;;  %v379_v43 = vld [vmem:[%s1246_s7 + $0x38] sm:$0xff]  ;;  %v464_v46 = vld [vmem:[%s1241_s2] sm:$0x1]  ;;  %v340_v56 = vunpack.c.0.s8 %v339_v55  ;;  %s719_s15 = sshll.u32 %s1026_s14, 4  ;;  %vm711_vm8 = vcmask 517120   ;;  %s720_s15 = int_to_ptr.vmem [resolvable:$true] %s719_s15 }
  0x3d   :  { %v79_v17 = vadd.f32 %v78_v15, %v77_v12  ;;  %v86_v18 = vadd.f32 %v85_v16, %v84_v13  ;;  %v889_v44 = vpack.c.bf16 %v379_v43, %v378_v42  ;;  %v465_v48 = vunpack.c.0.s8 %v464_v46  ;;  %v258_v8 = vld [vmem:[#allocation7] sm:$0xff]  ;;  %v260_v12 = vld [vmem:[#allocation7 + $0x10] sm:$0xff]  ;;  %v261_v13 = vld [vmem:[#allocation7 + $0x18] sm:$0xff]  ;;  %s989_s16 = scalar_lea.vmem %s720_s15, 32  ;;  %p994_p11 = scmp.lt.s32.totalorder %s720_s15, %s720_s15 }
  0x3e   :  { %860 = vmatpush3.bf16.msra.mxu1 %v859_v11  ;;  %v343_v57 = vsub.s32 %v340_v56, %v342_v47  ;;  %v524_v15 = vld [vmem:[%s1247_s8] sm:$0x3]  ;;  %p990_p10 = scmp.ne.s32.totalorder %s720_s15, %s989_s16  ;;  %p995_p12 = scmp.lt.s32.totalorder %s989_s16, %s989_s16 }
  0x3f   :  { %862 = vmatprep.subr.bf16.mxu1 %v861_v14  ;;  %v80_v19 = vrot.slane %v79_v17, 2  ;;  %v87_v20 = vrot.slane %v86_v18, 2  ;;  %v466_v50 = vcvt.s32.f32 %v465_v48 }
  0x40   :  { %p996_p13 = por %p995_p12, %p994_p11 }
  0x41   :  { %v81_v21 = vadd.f32 %v80_v19, %v79_v17  ;;  %v88_v22 = vadd.f32 %v87_v20, %v86_v18  ;;  %v470_v52 = vrot.slane %v466_v50, %v362_v49  ;;  %v477_v53 = vrot.slane %v466_v50, %v476_v51 }
  0x42   :  { %p997_p0 = pnand %p996_p13, %p990_p10 }
  0x43   :  { %v82_v23 = vrot.slane %v81_v21, 1  ;;  %v89_v24 = vrot.slane %v88_v22, 1  ;;  %472 = vbcast.lane.b32.xlu0 %v470_v52, 256 }
  0x45   :  { %v83_v25 = vadd.f32 %v82_v23, %v81_v21  ;;  %v90_v26 = vadd.f32 %v89_v24, %v88_v22 }
  0x47   :  { %v91_v29 = vmul.f32 0.125, %v83_v25  ;;  %v92_v30 = vmul.f32 0.125, %v90_v26  ;;  %479 = vbcast.lane.b32.xlu0 %v477_v53, 256 }
  0x49   :  { %v100_v32 = vsel %vm99_vm2, %v92_v30, %v91_v29 }
  0x4a   :  { %788 = vmatmul.mubr.msk.f32.vlgmr.msra.gmra.mrb[0].mxu1 %vm76_vm1, %v100_v32 }
  0x4b   :  { %864 = vmatpush3.bf16.msra.mxu1 %v861_v14  ;;  %798 = vmatprep.mubr.msk.f32.mxu1 %vm76_vm1, %v74_v9  ;;  %v259_v9 = vld [vmem:[#allocation7 + $0x8] sm:$0xff]  ;;  %v873_v14 = vpack.c.bf16 %v261_v13, %v260_v12 }
  0x4c   :  { %866 = vmatprep.subr.bf16.mxu1 %v865_v31  ;;  %v869_v11 = vpack.c.bf16 %v259_v9, %v258_v8  ;;  %v632_v9 = vld [vmem:[%s1245_s6 + $0x30] sm:$0xff] }
  0x4e   :  { %870 = vmatprep.subr.bf16.mxu0 %v869_v11 }
  0x4f   :  { %868 = vmatpush3.bf16.msra.mxu1 %v865_v31  ;;  %872 = vmatpush3.bf16.msra.mxu0 %v869_v11  ;;  %v633_v11 = vld [vmem:[%s1245_s6 + $0x38] sm:$0xff] }
  0x50   :  { %878 = vmatprep.subr.bf16.mxu1 %v877_v35  ;;  %874 = vmatprep.subr.bf16.mxu0 %v873_v14  ;;  %v903_v12 = vpack.c.bf16 %v633_v11, %v632_v9 }
  0x52   :  { %799 = vmatmul.mubr.msk.f32.vlgmr.msra.gmra.mrb[2].mxu1 %vm76_vm1, %v1138_v10 }
  0x53   :  { %880 = vmatpush3.bf16.msra.mxu1 %v877_v35  ;;  %876 = vmatpush3.bf16.msra.mxu0 %v873_v14 }
  0x54   :  { %882 = vmatprep.subr.bf16.mxu1 %v881_v38  ;;  %831 = vmatprep.subr.msk.mxu0 %vm531_vm4, %v524_v15 }
  0x56   :  { %810 = vmatmul.mubr.msk.f32.vlgmr.msra.gmra.mrb[0].mxu0 %vm76_vm1, %v1138_v10 }
  0x57   :  { %884 = vmatpush3.bf16.msra.mxu1 %v881_v38  ;;  %832 = vmatpush3.msk.msra.mxu0 %vm531_vm4, %v524_v15 }
  0x58   :  { %886 = vmatprep.subr.bf16.mxu1 %v885_v41  ;;  %893 = vmatprep.subr.bf16.mxu0 %v1022_v0 }
  0x5b   :  { %888 = vmatpush3.bf16.msra.mxu1 %v885_v41 }
  0x5c   :  { %890 = vmatprep.subr.bf16.mxu1 %v889_v44 }
  0x5f   :  { %892 = vmatpush3.bf16.msra.mxu1 %v889_v44 }
  0xb5   :  { %v473_v16 = vpop.permute.xlu0 %472 }
  0xb6   :  { %vm481_vm7 = vcmp.gt.f32.partialorder %v473_v16, 0.0 }
  0xb9   :  { %v480_v17 = vpop.permute.xlu0 %479 }
  0xba   :  { %vm482_vm5 = vcmp.gt.f32.partialorder %v480_v17, 0.0 }
 0x11d   :  { %v169_v58 = vpop.f32.mrb[0].mxu1 }
 0x11e   :  { %v344_v59 = vrot.slane %v169_v58, %v343_v57  ;;  %v789_v60 = vpop.f32.mrb[1].mxu1 }
 0x120   :  { %v345_v61 = vcombine.high %v344_v59, %v344_v59  ;;  %v352_v62 = vrot.slane %v344_v59, %v343_v57 }
 0x122   :  { %v359_v63 = vrot.slane %v345_v61, %v343_v57  ;;  %v363_v4 = vrot.slane %v352_v62, %v362_v49 }
 0x124   :  { %v367_v2 = vrot.slane %v359_v63, %v362_v49  ;;  %v626_v63 = vld [vmem:[%s1245_s6] sm:$0xff] }
 0x125   :  { %v800_v3 = vpop.f32.mrb[2].mxu1 }
 0x126   :  { %v371_v5 = vmul.f32 %v800_v3, %v367_v2  ;;  %v249_v6 = vpop.f32.mrb[3].mxu1  ;;  %v627_v2 = vld [vmem:[%s1245_s6 + $0x8] sm:$0xff] }
 0x127   :  { %v370_v7 = vmul.f32 %v363_v4, %v249_v6  ;;  %v894_v3 = vpack.c.bf16 %v627_v2, %v626_v63  ;;  %v628_v4 = vld [vmem:[%s1245_s6 + $0x10] sm:$0xff]  ;;  %v630_v6 = vld [vmem:[%s1245_s6 + $0x20] sm:$0xff] }
 0x129   :  { %828 = vmatprep.mubr.msk.f32.mxu1 %vm380_vm3, %v370_v7  ;;  %v811_v61 = vpop.f32.mrb[0].mxu0  ;;  %v631_v7 = vld [vmem:[%s1245_s6 + $0x28] sm:$0xff] }
 0x12a   :  { %829 = vmatmul.mubr.msk.f32.vlgmr.msra.gmra.mrb[4].mxu1 %vm380_vm3, %v371_v5  ;;  %v328_v62 = vpop.f32.mrb[1].mxu0  ;;  %v900_v8 = vpack.c.bf16 %v631_v7, %v630_v6 }
 0x1fd   :  { %v830_v18 = vpop.f32.mrb[4].mxu1 }
 0x1fe   :  { %v463_v19 = vmul.f32 0.17677669, %v830_v18  ;;  %v453_v20 = vpop.f32.mrb[5].mxu1 }
 0x1ff   :  { %v462_v21 = vmul.f32 0.17677669, %v453_v20 }
 0x200   :  { %v484_v22 = vsel %vm482_vm5, %v463_v19, -3.4028235e+38 }
 0x201   :  { %v493_v23 = vsel %vm485_vm6, %v484_v22, -inf  ;;  %v483_v24 = vsel %vm481_vm7, %v462_v21, -3.4028235e+38 }
 0x202   :  { %v494_v25 = vrot.slane %v493_v23, 4  ;;  %v486_v26 = vsel %vm485_vm6, %v483_v24, -inf }
 0x203   :  { %v487_v10 = vrot.slane %v486_v26, 4 }
 0x204   :  { %v495_v27 = vmax.f32 %v493_v23, %v494_v25 }
 0x205   :  { %v488_v28 = vmax.f32 %v486_v26, %v487_v10 }
 0x206   :  { %v496_v29 = vrot.slane %v495_v27, 2 }
 0x207   :  { %v489_v30 = vrot.slane %v488_v28, 2 }
 0x208   :  { %v497_v31 = vmax.f32 %v495_v27, %v496_v29 }
 0x209   :  { %v490_v32 = vmax.f32 %v488_v28, %v489_v30  ;;  %v709_v30 = vld [vmem:[%s1239_s0] sm:$0x3] }
 0x20a   :  { %v498_v33 = vrot.slane %v497_v31, 1 }
 0x20b   :  { %v491_v34 = vrot.slane %v490_v32, 1 }
 0x20c   :  { %v499_v35 = vmax.f32 %v497_v31, %v498_v33 }
 0x20d   :  { %v492_v36 = vmax.f32 %v490_v32, %v491_v34 }
 0x20e   :  { %v501_v37 = vsub.f32 %v484_v22, %v499_v35 }
 0x20f   :  { %v500_v38 = vsub.f32 %v483_v24, %v492_v36 }
 0x210   :  { %v504_v39 = vmul.f32 1.442695, %v501_v37 }
 0x211   :  { %v502_v40 = vmul.f32 1.442695, %v500_v38 }
 0x212   :  { %915 = vpow2.f32 %v504_v39 }
 0x213   :  { %917 = vpow2.f32 %v502_v40 }
 0x21c   :  { %v916_v41 = vpop.eup %915 }
 0x21d   :  { %v918_v42 = vpop.eup %917  ;;  %v513_v43 = vsel %vm485_vm6, %v916_v41, 0.0 }
 0x21e   :  { %v514_v44 = vrot.slane %v513_v43, 4  ;;  %v506_v45 = vsel %vm485_vm6, %v918_v42, 0.0 }
 0x21f   :  { %v507_v46 = vrot.slane %v506_v45, 4 }
 0x220   :  { %v515_v47 = vadd.f32 %v514_v44, %v513_v43 }
 0x221   :  { %v508_v48 = vadd.f32 %v507_v46, %v506_v45 }
 0x222   :  { %v516_v49 = vrot.slane %v515_v47, 2 }
 0x223   :  { %v509_v50 = vrot.slane %v508_v48, 2 }
 0x224   :  { %v517_v51 = vadd.f32 %v516_v49, %v515_v47 }
 0x225   :  { %v510_v52 = vadd.f32 %v509_v50, %v508_v48 }
 0x226   :  { %v518_v53 = vrot.slane %v517_v51, 1 }
 0x227   :  { %v511_v54 = vrot.slane %v510_v52, 1 }
 0x228   :  { %v519_v55 = vadd.f32 %v518_v53, %v517_v51 }
 0x229   :  { %v512_v56 = vadd.f32 %v511_v54, %v510_v52 }
 0x22a   :  { %919 = vrcp.f32 %v519_v55 }
 0x22b   :  { %921 = vrcp.f32 %v512_v56 }
 0x234   :  { %v920_v57 = vpop.eup %919 }
 0x235   :  { %v922_v58 = vpop.eup %921  ;;  %v523_v60 = vmul.f32 %v920_v57, %v916_v41 }
 0x236   :  { %v522_v59 = vmul.f32 %v922_v58, %v918_v42 }
 0x238   :  { %833 = vmatprep.mubr.msk.f32.mxu0 %vm485_vm6, %v522_v59 }
 0x239   :  { %834 = vmatmul.mubr.msk.f32.vlgmr.msra.gmra.mrb[2].mxu0 %vm485_vm6, %v523_v60 }
 0x23a   :  { %852 = vmatprep.mubr.msk.f32.mxu0 %vm1023_vm0, %v1024_v1  ;;  %895 = vmatpush3.bf16.msra.mxu0 %v894_v3  ;;  %v629_v1 = vld [vmem:[%s1245_s6 + $0x18] sm:$0xff] }
 0x23b   :  { %896 = vmatprep.subr.bf16.mxu0 %v1022_v0  ;;  %v897_v5 = vpack.c.bf16 %v629_v1, %v628_v4 }
 0x23e   :  { %898 = vmatpush3.bf16.msra.mxu0 %v897_v5 }
 0x23f   :  { %899 = vmatprep.subr.bf16.mxu0 %v1022_v0 }
 0x242   :  { %901 = vmatpush3.bf16.msra.mxu0 %v900_v8 }
 0x243   :  { %902 = vmatprep.subr.bf16.mxu0 %v1022_v0 }
 0x246   :  { %904 = vmatpush3.bf16.msra.mxu0 %v903_v12 }
 0x30c   :  { %v835_v13 = vpop.f32.mrb[2].mxu0 }
 0x30d   :  { %v611_v14 = vmul.f32 %v835_v13, %v811_v61  ;;  %v601_v15 = vpop.f32.mrb[3].mxu0 }
 0x30e   :  { %v610_v16 = vmul.f32 %v601_v15, %v328_v62 }
 0x30f   :  { %v619_v17 = vsel %vm380_vm3, %v611_v14, 0.0 }
 0x310   :  { %v620_v18 = vrot.slane %v619_v17, 4  ;;  %v612_v19 = vsel %vm380_vm3, %v610_v16, 0.0 }
 0x311   :  { %v613_v0 = vrot.slane %v612_v19, 4 }
 0x312   :  { %v621_v20 = vadd.f32 %v620_v18, %v619_v17 }
 0x313   :  { %v614_v21 = vadd.f32 %v613_v0, %v612_v19 }
 0x314   :  { %v622_v22 = vrot.slane %v621_v20, 2 }
 0x315   :  { %v615_v23 = vrot.slane %v614_v21, 2 }
 0x316   :  { %v623_v24 = vadd.f32 %v622_v22, %v621_v20 }
 0x317   :  { %v616_v25 = vadd.f32 %v615_v23, %v614_v21 }
 0x318   :  { %v624_v26 = vrot.slane %v623_v24, 1 }
 0x319   :  { %v617_v10 = vrot.slane %v616_v25, 1 }
 0x31a   :  { %v625_v27 = vadd.f32 %v624_v26, %v623_v24 }
 0x31b   :  { %v618_v28 = vadd.f32 %v617_v10, %v616_v25 }
 0x31d   :  { %v636_v29 = vsel %vm99_vm2, %v625_v27, %v618_v28 }
 0x31e   :  { %853 = vmatmul.mubr.msk.f32.vlgmr.msra.gmra.mrb[4].mxu0 %vm380_vm3, %v636_v29 }
 0x3f1   :  { %v705_v31 = vpop.f32.mrb[4].mxu0 }
 0x3f2   :  { %v710_v32 = vadd.f32 %v709_v30, %v705_v31  ;;  %v854_v33 = vpop.f32.mrb[5].mxu0 }
 0x3f4   :  { %712 = vst.msk [vmem:[#allocation8] sm:$0x3] %vm711_vm8, %v710_v32 }
 0x3f5   :  { %1000 = shalt.err (!%p997_p0)
}
 0x3f6   :  { %s1001_s19 = scalar_lea.hbm %s1248_s9, 32 }
 0x3f7   :  { %p1002_p1 = scmp.ne.s32.totalorder %s1248_s9, %s1001_s19  ;;  %p1005_p2 = scmp.lt.u32.totalorder %s1001_s19, %s1248_s9 }
 0x3f9   :  { %p1007_p3 = pnand %p1005_p2, %p1002_p1 }
 0x3fb   :  { %1010 = shalt.err (!%p1007_p3)
}
 0x3fc   :  { %722 = dma.vmem_to_hbm [thread:$0]  %s720_s15, 32, %s1248_s9, [#allocation4]  }
 0x3fd   :  { %1015 = dma.done.wait [#allocation4], 32  }
 0x3fe   :  { %1016 = vsyncadd [#allocation4], 4294967264 }
 0x3ff   :  { %726 = vsyncpa [#allocation3], 1 }
 0x400   :  { %727 = vsyncpa [#allocation6], 1 }
 0x401   :  { %728 = vsyncpa [#allocation4], 1 }

</bundles_post_ra>
